<compile_context>
chip_gen: v7x
topology: tpu7x:2x2x1
jax: 0.10.0
libtpu: 0.0.40
codegen_flags: <defaults>
</compile_context>

<pallas_src>
import jax
import jax.numpy as jnp
from jax import lax
from jax.experimental import pallas as pl
from jax.experimental.pallas import tpu as pltpu  # noqa: F401  (TPU backend)


def _model_kernel(x_ref, w_ref, o_ref):
    # W^T W via one MXU matmul (contract over the k=5 axis), f32 accumulate.
    wtw = lax.dot_general(
        w_ref[...], w_ref[...],
        dimension_numbers=(((0,), (0,)), ((), ())),
        preferred_element_type=jnp.float32,
    )                                                   # (2, 2)
    y = x_ref[...].astype(jnp.float32) + wtw            # addmm(x, W.T, W)
    z = jnp.concatenate([y, y], axis=1)                 # cat((y, y), dim=1) -> (2, 4)
    # stack((z, z, z), dim=1) -> (2, 3, 4), written directly as the kernel output.
    o_ref[...] = jnp.broadcast_to(z[:, None, :], o_ref.shape).astype(o_ref.dtype)


def _model_forward(x, w):
    B, D = x.shape                      # (2, 2)
    K = w.shape[0]                      # 5

    return pl.pallas_call(
        _model_kernel,
        out_shape=jax.ShapeDtypeStruct((B, 3, 2 * D), x.dtype),
        in_specs=[
            pl.BlockSpec((B, D), lambda: (0, 0)),
            pl.BlockSpec((K, D), lambda: (0, 0)),
        ],
        out_specs=pl.BlockSpec((B, 3, 2 * D), lambda: (0, 0, 0)),
        cost_estimate=pl.CostEstimate(
            flops=60, transcendentals=0, bytes_accessed=152),
    )(x, w)


model_forward = jax.jit(_model_forward)


def _reference(x, w):
    y = x + w.T @ w
    z = jnp.concatenate([y, y], axis=1)
    return jnp.stack([z, z, z], axis=1)


if __name__ == "__main__":
    key = jax.random.PRNGKey(0)
    kx, kw = jax.random.split(key)

    # Inputs / parameters (deterministic, shapes implied by the module).
    x = jax.random.normal(kx, (2, 2), dtype=jnp.float32)
    # nn.Linear(2, 5).weight has shape (5, 2); init deterministically.
    w = jax.random.normal(kw, (5, 2), dtype=jnp.float32) * 0.1

    out = model_forward(x, w)
    out = jax.block_until_ready(out)

    ref = _reference(x, w)
    assert out.shape == (2, 3, 4), out.shape
    assert jnp.allclose(out, ref, atol=1e-5, rtol=1e-5), "mismatch vs reference"

    print("KERNEL_OK")
</pallas_src>

<mosaic_0001>
module attributes {stable_mosaic.version = 11 : i64} {
  func.func @_model_kernel(%arg0: memref<2x2xf32, #tpu.memory_space<vmem>>, %arg1: memref<5x2xf32, #tpu.memory_space<vmem>>, %arg2: memref<2x3x4xf32, #tpu.memory_space<vmem>>) attributes {dimension_semantics = [], scalar_prefetch = 0 : i64, scratch_operands = 0 : i64, tpu.core_type = #tpu.core_type<tc>} {
    %c0 = arith.constant 0 : index
    %c0_0 = arith.constant 0 : index
    %0 = vector.load %arg1[%c0, %c0_0] : memref<5x2xf32, #tpu.memory_space<vmem>>, vector<5x2xf32>
    %c0_1 = arith.constant 0 : index
    %c0_2 = arith.constant 0 : index
    %1 = vector.load %arg1[%c0_1, %c0_2] : memref<5x2xf32, #tpu.memory_space<vmem>>, vector<5x2xf32>
    %cst = arith.constant dense<0.000000e+00> : vector<2x2xf32>
    %2 = tpu.matmul %0, %1, %cst {dimension_numbers = #tpu.dot_dimension_numbers<[0], [0], [1], [1], [0, 1, 1, 1], [], []>} : vector<5x2xf32>, vector<5x2xf32>, vector<2x2xf32> -> vector<2x2xf32>
    %c0_3 = arith.constant 0 : index
    %c0_4 = arith.constant 0 : index
    %3 = vector.load %arg0[%c0_3, %c0_4] : memref<2x2xf32, #tpu.memory_space<vmem>>, vector<2x2xf32>
    %4 = arith.addf %3, %2 : vector<2x2xf32>
    %5 = tpu.concatenate %4, %4 in 1 : vector<2x2xf32>, vector<2x2xf32> -> vector<2x4xf32>
    %6 = vector.shape_cast %5 : vector<2x4xf32> to vector<2x1x4xf32>
    %7 = vector.shape_cast %6 : vector<2x1x4xf32> to vector<2x1x4xf32>
    %8 = vector.broadcast %7 : vector<2x1x4xf32> to vector<2x3x4xf32>
    %c0_5 = arith.constant 0 : index
    %c0_6 = arith.constant 0 : index
    %c0_7 = arith.constant 0 : index
    %9 = vector.load %arg2[%c0_5, %c0_6, %c0_7] : memref<2x3x4xf32, #tpu.memory_space<vmem>>, vector<2x3x4xf32>
    tpu.vector_store %arg2[%c0_5, %c0_6, %c0_7], %8 {strides = array<i32>} : memref<2x3x4xf32, #tpu.memory_space<vmem>>, vector<2x3x4xf32>,
    return
  }
}

</mosaic_0001>

<bundles_post_ra>
// kernel: _model_forward.1
= control target key start
LH: loop header
LB: loop body
LE: loop exit
PB: predicated region body
PF: predicated region fallthrough
CT: control target
= control target key end

     0   :  { %v183_v1 = vmov 0.0   ;;  %vm184_vm0 = vmmov 0   ;;  %vm48_vm1 = vcmask 1044480   ;;  %vm44_vm2 = vcmask 39936   ;;  %s185_s13 = smov 2   ;;  %s214_s1 = inlined_call_operand.vmem [shape: f32[5,2], index: 1, kind: input, shape index: {}]   ;;  %s215_s0 = inlined_call_operand.vmem [shape: f32[2,2], index: 0, kind: input, shape index: {}]   ;;  %s216_s2 = inlined_call_operand.vmem [shape: f32[2,3,4], index: 2, kind: output, shape index: {}]  }
   0x1   :  { %v11_v0 = vld [vmem:[%s214_s1] sm:$0x1f]  ;;  %174 = vmatprep.subr.mxu0 %v183_v1  ;;  %176 = vmatprep.mubr.msk.f32.mxu0 %vm184_vm0, %v183_v1  ;;  %v186_v7 = vmov 1966171168   ;;  %v134_v9 = vlaneseq  ;;  %vm128_vm3 = vcmask 15360   ;;  %vm163_vm4 = vcmask 26624  }
   0x2   :  { %12 = vxpose.xlu0.b32.start.end [1/1] (short) (narrow) %v11_v0, 8  ;;  %175 = vmatpush3.msk.msra.mxu0 %vm48_vm1, %v11_v0  ;;  %v122_v3 = vld [vmem:[%s215_s0] sm:$0x3]  ;;  %v132_v8 = vunpack.c.l.s4 %v186_v7 }
   0x3   :  { %v135_v11 = vshrl.u32 %v134_v9, 7 }
   0x4   :  { %v133_v10 = vunpack.c.0.s8 %v132_v8 }
   0x5   :  { %v155_v15 = vsub.s32 0, %v135_v11 }
   0x6   :  { %v136_v12 = vsub.s32 %v133_v10, %v135_v11 }
  0x82   :  { %v28_v2 = vpop.trf.xlu0 }
  0x83   :  { %177 = vmatmul.mubr.msk.f32.vlgmr.msra.gmra.mrb[0].mxu0 %vm44_vm2, %v28_v2 }
 0x156   :  { %v118_v4 = vpop.f32.mrb[0].mxu0 }
 0x157   :  { %v123_v5 = vadd.f32 %v122_v3, %v118_v4  ;;  %v178_v6 = vpop.f32.mrb[1].mxu0 }
 0x159   :  { %125 = vrot.lane.b32.xlu0 %v123_v5, %s185_s13 }
 0x1cb   :  { %v126_v13 = vpop.permute.xlu0 %125 }
 0x1cc   :  { %v129_v14 = vsel %vm128_vm3, %v123_v5, %v126_v13 }
 0x1cd   :  { %v137_v16 = vrot.slane %v129_v14, %v136_v12 }
 0x1cf   :  { %v138_v17 = vcombine.high %v137_v16, %v137_v16  ;;  %v145_v18 = vrot.slane %v137_v16, %v136_v12 }
 0x1d1   :  { %v152_v19 = vrot.slane %v138_v17, %v136_v12  ;;  %v156_v20 = vrot.slane %v145_v18, %v155_v15 }
 0x1d3   :  { %v160_v21 = vrot.slane %v152_v19, %v155_v15  ;;  %164 = vst.msk [vmem:[%s216_s2] sm:$0x7] %vm163_vm4, %v156_v20 }
 0x1d5   :  { %165 = vst.msk [vmem:[%s216_s2 + $0x4] sm:$0x7] %vm163_vm4, %v160_v21 }

</bundles_post_ra>
